<compile_context>
chip_gen: v7x
topology: tpu7x:2x2x1
jax: 0.10.0
libtpu: 0.0.40
codegen_flags: <defaults>
</compile_context>

<pallas_src>
import functools

import jax
import jax.numpy as jnp
from jax.experimental import pallas as pl
from jax.experimental.pallas import tpu as pltpu

LANE = 128          # padded feature width (TPU lane width)
SUBLANE = 8
MAX_ROW_TILE = 2048  # large-batch row tile (few MiB VMEM, fine on all gens)


def _round_up(x, m):
    return (x + m - 1) // m * m


def _exists_kernel(x_ref, params_ref, out_ref, *, hp):
    # x_ref:      [row_tile, hp] bf16; lanes [0:H)=feat, [H:2H)=keyword,
    #                                  [2H:3H)=feat*keyword, rest zero.
    # params_ref: [2*hp + 8, hp] bf16; rows [0:hp)=W1 (zero-padded),
    #                                  [hp:2hp)=W2, row 2hp = b1, row 2hp+1 = b2.
    # out_ref:    [row_tile, hp]
    x = x_ref[...]
    w1 = params_ref[pl.ds(0, hp), :]
    w2 = params_ref[pl.ds(hp, hp), :]
    bias = params_ref[pl.ds(2 * hp, SUBLANE), :].astype(jnp.float32)
    b1 = bias[0:1, :]
    b2 = bias[1:2, :]

    # Layer 1: single K=hp bf16 MXU matmul (the concat is in the lane packing).
    h = jnp.dot(x, w1, preferred_element_type=jnp.float32)
    h = jnp.maximum(h + b1, 0.0)

    # Layer 2.
    o = jnp.dot(h.astype(w2.dtype), w2, preferred_element_type=jnp.float32)
    out_ref[...] = jnp.maximum(o + b2, 0.0).astype(out_ref.dtype)


def pack_params(w1, b1, w2, b2, hp=LANE, dtype=jnp.bfloat16):
    """Pack W1 [3H,H], b1 [H], W2 [H,H], b2 [H] into one [2*hp+8, hp] block.

    Note: weights here are in x@W layout (a PyTorch nn.Linear weight would be
    transposed before packing).
    """
    h = w2.shape[0]
    assert w1.shape == (3 * h, h) and w2.shape == (h, h)
    assert b1.shape == (h,) and b2.shape == (h,)
    assert 3 * h <= hp

    def pad_mat(m):
        return jnp.pad(m, ((0, hp - m.shape[0]), (0, hp - m.shape[1])))

    bias = jnp.zeros((SUBLANE, hp), w1.dtype)
    bias = bias.at[0, :h].set(b1)
    bias = bias.at[1, :h].set(b2)
    packed = jnp.concatenate([pad_mat(w1), pad_mat(w2), bias], axis=0)
    return packed.astype(dtype)


@jax.jit
def exists_module(keyword, feat, packed_params):
    """keyword, feat: [H] or [B, H]. Returns [H] / [B, H] (module's forward)."""
    squeeze = keyword.ndim == 1
    if squeeze:
        keyword = keyword[None, :]
        feat = feat[None, :]
    b, h = keyword.shape
    rows, hp = packed_params.shape
    assert rows == 2 * hp + SUBLANE and 3 * h <= hp

    # Row tiling: pad batch only to the sublane; pick >=2 grid steps for large
    # batches so v7x's second TensorCore gets work; last tile may be partial.
    bp = _round_up(b, SUBLANE)
    if bp >= 2 * MAX_ROW_TILE:
        row_tile = MAX_ROW_TILE
    elif bp > 512:
        row_tile = _round_up(pl.cdiv(bp, 2), SUBLANE)
    else:
        row_tile = bp
    grid = pl.cdiv(bp, row_tile)

    # Lane-pack [feat | keyword | feat*keyword | 0...] -> [bp, hp] bf16.
    # Under jit this is one small fused XLA op feeding the kernel.
    x = jnp.concatenate([feat, keyword, feat * keyword], axis=-1)
    x = jnp.pad(x, ((0, bp - b), (0, hp - 3 * h))).astype(jnp.bfloat16)

    out = pl.pallas_call(
        functools.partial(_exists_kernel, hp=hp),
        out_shape=jax.ShapeDtypeStruct((bp, hp), keyword.dtype),
        grid=(grid,),
        in_specs=[
            pl.BlockSpec((row_tile, hp), lambda i: (i, 0)),
            pl.BlockSpec((rows, hp), lambda i: (0, 0)),  # resident weight block
        ],
        out_specs=pl.BlockSpec((row_tile, hp), lambda i: (i, 0)),
        compiler_params=pltpu.CompilerParams(dimension_semantics=("parallel",)),
    )(x, packed_params)

    out = out[:b, :h]
    return out[0] if squeeze else out


if __name__ == "__main__":
    hidden = 32
    key = jax.random.PRNGKey(0)
    k1, k2, k3, k4, k5, k6 = jax.random.split(key, 6)

    keyword = jax.random.normal(k1, (hidden,), dtype=jnp.float32)
    feat = jax.random.normal(k2, (hidden,), dtype=jnp.float32)

    w1 = 0.1 * jax.random.normal(k3, (3 * hidden, hidden), dtype=jnp.float32)
    b1 = 0.1 * jax.random.normal(k4, (hidden,), dtype=jnp.float32)
    w2 = 0.1 * jax.random.normal(k5, (hidden, hidden), dtype=jnp.float32)
    b2 = 0.1 * jax.random.normal(k6, (hidden,), dtype=jnp.float32)

    packed = pack_params(w1, b1, w2, b2)

    # Unbatched call — matches the module's forward(keyword, feat) -> [hidden].
    result = exists_module(keyword, feat, packed)
    jax.block_until_ready(result)

    def ref_forward(kw_v, ft_v):
        x = jnp.concatenate([ft_v, kw_v, ft_v * kw_v])
        hh = jnp.maximum(
            jnp.dot(x, w1, precision=jax.lax.Precision.HIGHEST) + b1, 0.0)
        return jnp.maximum(
            jnp.dot(hh, w2, precision=jax.lax.Precision.HIGHEST) + b2, 0.0)

    expected = ref_forward(keyword, feat)
    assert result.shape == (hidden,)
    # bf16 weight/activation storage (per perf review) vs f32 reference ->
    # relaxed tolerance.
    assert jnp.allclose(result, expected, atol=2e-2, rtol=2e-2), "mismatch (unbatched)"

    # Batched path (amortizes pallas_call / DMA overhead across rows).
    B = 4
    kb = jax.random.normal(jax.random.PRNGKey(1), (B, hidden), dtype=jnp.float32)
    fb = jax.random.normal(jax.random.PRNGKey(2), (B, hidden), dtype=jnp.float32)
    res_b = exists_module(kb, fb, packed)
    jax.block_until_ready(res_b)
    exp_b = jax.vmap(ref_forward)(kb, fb)
    assert res_b.shape == (B, hidden)
    assert jnp.allclose(res_b, exp_b, atol=2e-2, rtol=2e-2), "mismatch (batched)"

    print("KERNEL_OK")
</pallas_src>

<mosaic_0001>
module attributes {stable_mosaic.version = 11 : i64} {
  func.func @_exists_kernel(%arg0: i32, %arg1: memref<8x128xbf16, #tpu.memory_space<vmem>>, %arg2: memref<264x128xbf16, #tpu.memory_space<vmem>>, %arg3: memref<8x128xf32, #tpu.memory_space<vmem>>) attributes {dimension_semantics = [#tpu.dimension_semantics<parallel>], iteration_bounds = array<i64: 1>, scalar_prefetch = 0 : i64, scratch_operands = 0 : i64, tpu.core_type = #tpu.core_type<tc>, window_params = [{transform_indices = @transform_0, window_bounds = array<i64: 8, 128>}, {pipeline_mode = #tpu.pipeline_mode<synchronous>, transform_indices = @transform_1, window_bounds = array<i64: 264, 128>}, {transform_indices = @transform_2, window_bounds = array<i64: 8, 128>}]} {
    %c0 = arith.constant 0 : index
    %c0_0 = arith.constant 0 : index
    %0 = vector.load %arg1[%c0, %c0_0] : memref<8x128xbf16, #tpu.memory_space<vmem>>, vector<8x128xbf16>
    %c0_1 = arith.constant 0 : index
    %c0_2 = arith.constant 0 : index
    %1 = vector.load %arg2[%c0_1, %c0_2] : memref<264x128xbf16, #tpu.memory_space<vmem>>, vector<128x128xbf16>
    %c128 = arith.constant 128 : index
    %c0_3 = arith.constant 0 : index
    %2 = vector.load %arg2[%c128, %c0_3] : memref<264x128xbf16, #tpu.memory_space<vmem>>, vector<128x128xbf16>
    %c256 = arith.constant 256 : index
    %c0_4 = arith.constant 0 : index
    %3 = vector.load %arg2[%c256, %c0_4] : memref<264x128xbf16, #tpu.memory_space<vmem>>, vector<8x128xbf16>
    %4 = arith.extf %3 : vector<8x128xbf16> to vector<8x128xf32>
    %5 = vector.extract_strided_slice %4 {offsets = [0, 0], sizes = [1, 128], strides = [1, 1]} : vector<8x128xf32> to vector<1x128xf32>
    %6 = vector.extract_strided_slice %4 {offsets = [1, 0], sizes = [1, 128], strides = [1, 1]} : vector<8x128xf32> to vector<1x128xf32>
    %cst = arith.constant dense<0.000000e+00> : vector<8x128xf32>
    %7 = tpu.matmul %0, %1, %cst {dimension_numbers = #tpu.dot_dimension_numbers<[1], [0], [0], [1], [0, 0, 1, 1], [], []>} : vector<8x128xbf16>, vector<128x128xbf16>, vector<8x128xf32> -> vector<8x128xf32>
    %8 = vector.broadcast %5 : vector<1x128xf32> to vector<8x128xf32>
    %9 = arith.addf %7, %8 : vector<8x128xf32>
    %cst_5 = arith.constant 0.000000e+00 : f32
    %10 = vector.broadcast %cst_5 : f32 to vector<8x128xf32>
    %11 = arith.maximumf %9, %10 : vector<8x128xf32>
    %12 = arith.truncf %11 : vector<8x128xf32> to vector<8x128xbf16>
    %cst_6 = arith.constant dense<0.000000e+00> : vector<8x128xf32>
    %13 = tpu.matmul %12, %2, %cst_6 {dimension_numbers = #tpu.dot_dimension_numbers<[1], [0], [0], [1], [0, 0, 1, 1], [], []>} : vector<8x128xbf16>, vector<128x128xbf16>, vector<8x128xf32> -> vector<8x128xf32>
    %14 = vector.broadcast %6 : vector<1x128xf32> to vector<8x128xf32>
    %15 = arith.addf %13, %14 : vector<8x128xf32>
    %cst_7 = arith.constant 0.000000e+00 : f32
    %16 = vector.broadcast %cst_7 : f32 to vector<8x128xf32>
    %17 = arith.maximumf %15, %16 : vector<8x128xf32>
    %c0_8 = arith.constant 0 : index
    %c0_9 = arith.constant 0 : index
    %18 = vector.load %arg3[%c0_8, %c0_9] : memref<8x128xf32, #tpu.memory_space<vmem>>, vector<8x128xf32>
    tpu.vector_store %arg3[%c0_8, %c0_9], %17 {strides = array<i32>} : memref<8x128xf32, #tpu.memory_space<vmem>>, vector<8x128xf32>,
    return
  }
  func.func @transform_0(%arg0: i32) -> (i32, i32) {
    %c0_i32 = arith.constant 0 : i32
    %c0_i32_0 = arith.constant 0 : i32
    return %arg0, %c0_i32 : i32, i32
  }
  func.func @transform_1(%arg0: i32) -> (i32, i32) {
    %c0_i32 = arith.constant 0 : i32
    %c0_i32_0 = arith.constant 0 : i32
    %c0_i32_1 = arith.constant 0 : i32
    return %c0_i32, %c0_i32_0 : i32, i32
  }
  func.func @transform_2(%arg0: i32) -> (i32, i32) {
    %c0_i32 = arith.constant 0 : i32
    %c0_i32_0 = arith.constant 0 : i32
    return %arg0, %c0_i32 : i32, i32
  }
}

</mosaic_0001>

<bundles_post_ra>
// kernel: exists_module.1
= control target key start
LH: loop header
LB: loop body
LE: loop exit
PB: predicated region body
PF: predicated region fallthrough
CT: control target
= control target key end

     0   :  { %7 = vsyncpa [#allocation3], 0  ;;  %s373_s9 = smov [#allocation2]   ;;  %s411_s0 = inlined_call_operand.vmem [shape: bf16[8,128], index: 0, kind: input, shape index: {}]   ;;  %s412_s1 = inlined_call_operand.hbm [shape: bf16[264,128], index: 1, kind: input, shape index: {}]   ;;  %s413_s2 = inlined_call_operand.vmem [shape: f32[8,128], index: 2, kind: output, shape index: {}]  }
   0x1   :  { %s15_s10 = sshll.u32 %s373_s9, 4  ;;  %s349_s13 = scalar_lea.hbm %s412_s1, 2112  ;;  %s16_s10 = int_to_ptr.vmem [resolvable:$true] %s15_s10 }
   0x2   :  { %p350_p0 = scmp.ne.s32.totalorder %s412_s1, %s349_s13  ;;  %p353_p1 = scmp.lt.u32.totalorder %s349_s13, %s412_s1 }
   0x4   :  { %p355_p2 = pnand %p353_p1, %p350_p0 }
   0x6   :  { %358 = shalt.err (!%p355_p2)
}
   0x7   :  { %s359_s18 = scalar_lea.vmem %s16_s10, 2112  ;;  %p364_p4 = scmp.lt.s32.totalorder %s16_s10, %s16_s10 }
   0x8   :  { %p360_p3 = scmp.ne.s32.totalorder %s16_s10, %s359_s18  ;;  %p365_p5 = scmp.lt.s32.totalorder %s359_s18, %s359_s18 }
   0xa   :  { %p366_p6 = por %p365_p5, %p364_p4 }
   0xc   :  { %p367_p7 = pnand %p366_p6, %p360_p3 }
   0xe   :  { %370 = shalt.err (!%p367_p7)
}
   0xf   :  { %s374_s19 = smov 64   ;;  %s375_s20 = smov 4  }
  0x10   :  { %21 = dma.hbm_to_vmem [thread:$0]  %s412_s1, 2112, %s16_s10, [#allocation3], %s374_s19, %s374_s19, %s375_s20  }
  0x11   :  { %371 = dma.done.wait [#allocation3], 2112  }
  0x12   :  { %372 = vsyncadd [#allocation3], 4294965184  ;;  %v376_v0 = vmov 0.0   ;;  %vm377_vm0 = vmmov 0   ;;  %v333_v1 = vld [vmem:[#allocation2] sm:$0xff]   ;;  %v334_v2 = vld [vmem:[#allocation2 + $0x8] sm:$0xff]   ;;  %v61_v18 = vlaneseq }
  0x13   :  { %288 = vmatprep.subr.bf16.mxu0 %v376_v0  ;;  %304 = vmatprep.mubr.msk.bf16.mxu0 %vm377_vm0, %v376_v0  ;;  %v335_v3 = vld [vmem:[#allocation2 + $0x10] sm:$0xff]   ;;  %v341_v4 = vld [vmem:[#allocation2 + $0x40] sm:$0xff]   ;;  %v336_v5 = vld [vmem:[#allocation2 + $0x18] sm:$0xff]  }
  0x14   :  { %308 = vmatprep.subr.bf16.mxu1 %v376_v0  ;;  %324 = vmatprep.mubr.msk.bf16.mxu1 %vm377_vm0, %v376_v0  ;;  %v342_v6 = vld [vmem:[#allocation2 + $0x48] sm:$0xff]   ;;  %v337_v7 = vld [vmem:[#allocation2 + $0x20] sm:$0xff]   ;;  %v343_v8 = vld [vmem:[#allocation2 + $0x50] sm:$0xff]   ;;  %v62_v19 = vshrl.u32 %v61_v18, 7 }
  0x15   :  { %289 = vmatpush3.bf16.msra.mxu0 %v333_v1  ;;  %309 = vmatpush3.bf16.msra.mxu1 %v341_v4  ;;  %v338_v9 = vld [vmem:[#allocation2 + $0x28] sm:$0xff]   ;;  %v344_v10 = vld [vmem:[#allocation2 + $0x58] sm:$0xff]   ;;  %v339_v11 = vld [vmem:[#allocation2 + $0x30] sm:$0xff]  }
  0x16   :  { %290 = vmatprep.subr.bf16.mxu0 %v376_v0  ;;  %310 = vmatprep.subr.bf16.mxu1 %v376_v0  ;;  %v345_v12 = vld [vmem:[#allocation2 + $0x60] sm:$0xff]   ;;  %v340_v13 = vld [vmem:[#allocation2 + $0x38] sm:$0xff]   ;;  %v346_v14 = vld [vmem:[#allocation2 + $0x68] sm:$0xff]   ;;  %v63_v22 = vsub.s32 0, %v62_v19  ;;  %v157_v31 = vsub.s32 1, %v62_v19 }
  0x17   :  { %v26_v15 = vld [vmem:[%s411_s0] sm:$0xf]  ;;  %v347_v16 = vld [vmem:[#allocation2 + $0x70] sm:$0xff]   ;;  %v348_v17 = vld [vmem:[#allocation2 + $0x78] sm:$0xff]  }
  0x18   :  { %v59_v20 = vld [vmem:[#allocation2 + $0x80] sm:$0xf] }
  0x19   :  { %291 = vmatpush3.bf16.msra.mxu0 %v334_v2  ;;  %311 = vmatpush3.bf16.msra.mxu1 %v342_v6  ;;  %v60_v21 = vunpack.c.l.bf16 %v59_v20 }
  0x1a   :  { %292 = vmatprep.subr.bf16.mxu0 %v376_v0  ;;  %312 = vmatprep.subr.bf16.mxu1 %v376_v0 }
  0x1b   :  { %v64_v23 = vrot.slane %v60_v21, %v63_v22  ;;  %v158_v32 = vrot.slane %v60_v21, %v157_v31 }
  0x1d   :  { %293 = vmatpush3.bf16.msra.mxu0 %v335_v3  ;;  %313 = vmatpush3.bf16.msra.mxu1 %v343_v8 }
  0x1e   :  { %294 = vmatprep.subr.bf16.mxu0 %v376_v0  ;;  %314 = vmatprep.subr.bf16.mxu1 %v376_v0 }
  0x21   :  { %295 = vmatpush3.bf16.msra.mxu0 %v336_v5  ;;  %315 = vmatpush3.bf16.msra.mxu1 %v344_v10 }
  0x22   :  { %296 = vmatprep.subr.bf16.mxu0 %v376_v0  ;;  %316 = vmatprep.subr.bf16.mxu1 %v376_v0 }
  0x25   :  { %297 = vmatpush3.bf16.msra.mxu0 %v337_v7  ;;  %317 = vmatpush3.bf16.msra.mxu1 %v345_v12 }
  0x26   :  { %298 = vmatprep.subr.bf16.mxu0 %v376_v0  ;;  %318 = vmatprep.subr.bf16.mxu1 %v376_v0 }
  0x29   :  { %299 = vmatpush3.bf16.msra.mxu0 %v338_v9  ;;  %319 = vmatpush3.bf16.msra.mxu1 %v346_v14 }
  0x2a   :  { %300 = vmatprep.subr.bf16.mxu0 %v376_v0  ;;  %320 = vmatprep.subr.bf16.mxu1 %v376_v0 }
  0x2d   :  { %301 = vmatpush3.bf16.msra.mxu0 %v339_v11  ;;  %321 = vmatpush3.bf16.msra.mxu1 %v347_v16 }
  0x2e   :  { %302 = vmatprep.subr.bf16.mxu0 %v376_v0  ;;  %322 = vmatprep.subr.bf16.mxu1 %v376_v0 }
  0x31   :  { %303 = vmatpush3.bf16.msra.mxu0 %v340_v13  ;;  %323 = vmatpush3.bf16.msra.mxu1 %v348_v17 }
  0x34   :  { %305 = vmatmul.mubr.bf16.vlgmr.msra.gmra.mrb[0].mxu0 %v26_v15 }
 0x107   :  { %v147_v24 = vpop.f32.mrb[0].mxu0 }
 0x108   :  { %v148_v25 = vadd.f32 %v147_v24, %v64_v23  ;;  %v306_v26 = vpop.f32.mrb[1].mxu0 }
 0x109   :  { %v150_v27 = vpop.f32.mrb[2].mxu0 }
 0x10a   :  { %v153_v28 = vmax.f32 %v148_v25, 0.0  ;;  %v307_v29 = vpop.f32.mrb[3].mxu0 }
 0x10c   :  { %v154_v30 = vpack.c.bf16 %v153_v28, %v153_v28 }
 0x10e   :  { %325 = vmatmul.mubr.bf16.vlgmr.msra.gmra.mrb[0].mxu1 %v154_v30 }
 0x1e1   :  { %v241_v33 = vpop.f32.mrb[0].mxu1 }
 0x1e2   :  { %v242_v34 = vadd.f32 %v241_v33, %v158_v32  ;;  %v326_v35 = vpop.f32.mrb[1].mxu1 }
 0x1e3   :  { %v244_v36 = vpop.f32.mrb[2].mxu1 }
 0x1e4   :  { %v247_v37 = vmax.f32 %v242_v34, 0.0  ;;  %v327_v38 = vpop.f32.mrb[3].mxu1 }
 0x1e6   :  { %248 = vst [vmem:[%s413_s2] sm:$0xff] %v247_v37 }
 0x1e7   :  { %253 = vsyncpa [#allocation3], 1 }

</bundles_post_ra>
